<compile_context>
chip_gen: v7x
topology: tpu7x:2x2x1
jax: 0.10.0
libtpu: 0.0.40
codegen_flags: <defaults>
</compile_context>

<pallas_src>
import functools

import jax
import jax.numpy as jnp
from jax.experimental import pallas as pl
from jax.experimental.pallas import tpu as pltpu


def _round_up(x, m):
    return ((x + m - 1) // m) * m


def _pow2_floor(x):
    p = 1
    while p * 2 <= x:
        p *= 2
    return p


def _agg_kernel(q_ref, k_ref, logits_ref, bias_ref, out_ref, l_sc, acc_sc,
                *, use_bf16_exp):
    # q_ref:      (TM, Dp) bf16 pre-normalized, pre-scaled query rows
    # k_ref:      (TK, Dp) bf16 pre-normalized, pre-scaled key rows
    # logits_ref: (TK, Cp) bf16 logits for this key tile
    # bias_ref:   (1,  TK) f32  per-key-column bias (-1/tau real, -1e9 padded)
    # out_ref:    (TM, Cp) bf16 aggregated logits for this query tile
    # l_sc:       (TM, 1)  f32  softmax denominator accumulator
    # acc_sc:     (TM, Cp) f32  numerator accumulator
    kv = pl.program_id(1)

    @pl.when(kv == 0)
    def _():
        l_sc[...] = jnp.zeros_like(l_sc)
        acc_sc[...] = jnp.zeros_like(acc_sc)

    # similarity (TM, TK): contract both operands on D — no explicit .T, so no
    # XLU transpose before the MXU push; f32 accumulation.
    sim = jax.lax.dot_general(
        q_ref[...], k_ref[...],
        dimension_numbers=(((1,), (1,)), ((), ())),
        preferred_element_type=jnp.float32)

    # Fixed stable-softmax shift + padded-key mask in one broadcast add:
    # unit-norm rows guarantee sim <= 1/tau, so exp(sim - 1/tau) never
    # overflows and no running max / rescale is required.
    e = sim + bias_ref[...]
    if use_bf16_exp:
        p = jnp.exp(e.astype(jnp.bfloat16))             # bf16 EUP (v6e/v7x)
        l_sc[...] += jnp.sum(p.astype(jnp.float32), axis=1, keepdims=True)
    else:
        pf = jnp.exp(e)                                  # f32 EUP (v5e etc.)
        l_sc[...] += jnp.sum(pf, axis=1, keepdims=True)
        p = pf.astype(jnp.bfloat16)

    # numerator: bf16 MXU operands, f32 accumulation.
    acc_sc[...] += jnp.dot(p, logits_ref[...],
                           preferred_element_type=jnp.float32)

    @pl.when(kv == pl.num_programs(1) - 1)
    def _():
        out = acc_sc[...] * pl.reciprocal(l_sc[...], approx=True)
        out_ref[...] = out.astype(out_ref.dtype)


def self_nonparametric_vis_forward(
    anchor_feat, positive_feat, lb_feat, lb_one_hot,
    logits_x_lb, logits_x_ulb_1, logits_x_ulb_2,
    labels_lb, labels_ulb, *, aggregator_tau,
):
    # glue: build the concatenated blocks the kernel operates on
    feats = jnp.concatenate([lb_feat, anchor_feat, positive_feat],
                            axis=0).astype(jnp.float32)
    logits_before = jnp.concatenate(
        [logits_x_lb, logits_x_ulb_1, logits_x_ulb_2], axis=0)

    M, D = feats.shape
    C = logits_before.shape[1]
    inv_tau = 1.0 / float(aggregator_tau)

    # One-shot f32 normalization (F.normalize clamp semantics) with sqrt(1/tau)
    # folded into every row, then bf16: (x_i*s).(x_j*s) == (x_i.x_j)/tau.
    sq = jnp.sum(feats * feats, axis=1, keepdims=True)
    scale = jax.lax.rsqrt(jnp.maximum(sq, 1e-24)) * (inv_tau ** 0.5)
    feats_n = (feats * scale).astype(jnp.bfloat16)

    # hardware-friendly padded sizes: lane-dense D/C, power-of-two row tiles
    Dp = _round_up(max(D, 128), 128)
    Cp = _round_up(max(C, 128), 128)
    # >=2 query tiles whenever possible so both v7x TensorCores get work;
    # key tile multiple of 128 so the (TM, TK) sim slab is lane-dense.
    TM = max(8, min(256, _pow2_floor(max(8, -(-M // 2)))))
    TK = min(512, _round_up(M, 128))
    TK = _round_up(TK, TM)                 # keep TK a multiple of TM
    Mp = _round_up(M, TK)                  # multiple of both TM and TK

    feats_p = jnp.zeros((Mp, Dp), jnp.bfloat16).at[:M, :D].set(feats_n)
    # logits travel as bf16 so the HBM->VMEM DMA moves half the bytes
    logits_p = jnp.zeros((Mp, Cp), jnp.bfloat16).at[:M, :C].set(
        logits_before.astype(jnp.bfloat16))
    # per-key-column softmax bias: -1/tau (stable shift) for real columns,
    # -1e9 for padded columns so they drop out of the softmax.
    col = jnp.arange(Mp)
    bias = jnp.where(col < M, -inv_tau, -1e9).astype(jnp.float32)[None, :]

    grid = (Mp // TM, Mp // TK)

    # bf16 exp only on chips with a bf16 EUP (v6e / v7x); f32 elsewhere.
    try:
        kind = jax.devices()[0].device_kind.lower()
    except Exception:
        kind = ""
    use_bf16_exp = ("v6" in kind) or ("v7" in kind)

    # VMEM budget: tiled design, O(tile) and independent of M.
    pipelined = 2 * (TM * Dp * 2 + TK * Dp * 2 + TK * Cp * 2
                     + 8 * TK * 4 + TM * Cp * 2)       # double-buffered blocks
    scratch = TM * Cp * 4 + TM * 128 * 4               # acc + padded denom
    temps = 4 * TM * TK * 4                            # sim / exp / p slabs
    est = pipelined + scratch + temps + (4 << 20)
    try:
        cap = int(pltpu.get_tpu_info().vmem_capacity_bytes)
    except Exception:
        cap = 64 << 20                                 # conservative (v7x)
    vmem_limit = int(min(max(est, 32 << 20), max(cap - (8 << 20), 16 << 20)))

    kernel = functools.partial(_agg_kernel, use_bf16_exp=use_bf16_exp)

    out_p = pl.pallas_call(
        kernel,
        out_shape=jax.ShapeDtypeStruct((Mp, Cp), jnp.bfloat16),
        grid=grid,
        in_specs=[
            pl.BlockSpec((TM, Dp), lambda i, kv: (i, 0)),    # query tile
            pl.BlockSpec((TK, Dp), lambda i, kv: (kv, 0)),   # key tile
            pl.BlockSpec((TK, Cp), lambda i, kv: (kv, 0)),   # logits tile
            pl.BlockSpec((1, TK), lambda i, kv: (0, kv)),    # bias / mask row
        ],
        out_specs=pl.BlockSpec((TM, Cp), lambda i, kv: (i, 0)),
        scratch_shapes=[
            pltpu.VMEM((TM, 1), jnp.float32),                # softmax denom
            pltpu.VMEM((TM, Cp), jnp.float32),               # output accum
        ],
        compiler_params=pltpu.CompilerParams(
            dimension_semantics=("parallel", "arbitrary"),
            vmem_limit_bytes=vmem_limit,
        ),
    )(feats_p, feats_p, logits_p, bias)

    logits_after = out_p[:M, :C].astype(jnp.float32)

    num_lb = logits_x_lb.shape[0]
    new_logits_x_lb = logits_after[:num_lb]
    ulb = logits_after[num_lb:]
    half = ulb.shape[0] // 2
    new_logits_x_ulb_1 = ulb[:half]
    new_logits_x_ulb_2 = ulb[half:]

    return (anchor_feat, positive_feat, lb_feat, lb_one_hot,
            new_logits_x_lb, new_logits_x_ulb_1, new_logits_x_ulb_2)


def _reference(anchor_feat, positive_feat, lb_feat, logits_x_lb,
               logits_x_ulb_1, logits_x_ulb_2, tau):
    # pure-JAX f32 reference of the aggregation hot path
    def l2n(x):
        n = jnp.sqrt(jnp.sum(x * x, axis=1, keepdims=True))
        return x / jnp.maximum(n, 1e-12)

    feats = jnp.concatenate([l2n(lb_feat), l2n(anchor_feat), l2n(positive_feat)], 0)
    logits_before = jnp.concatenate([logits_x_lb, logits_x_ulb_1, logits_x_ulb_2], 0)
    sim = feats @ feats.T / tau
    p = jax.nn.softmax(sim, axis=1)
    return p @ logits_before


if __name__ == "__main__":
    key = jax.random.PRNGKey(0)
    k1, k2, k3, k4, k5, k6, k7 = jax.random.split(key, 7)

    N_lb, N_ulb, D, C = 8, 8, 32, 16
    tau = 0.5

    anchor_feat = jax.random.normal(k1, (N_ulb, D), dtype=jnp.float32)
    positive_feat = jax.random.normal(k2, (N_ulb, D), dtype=jnp.float32)
    lb_feat = jax.random.normal(k3, (N_lb, D), dtype=jnp.float32)
    labels_lb = jax.random.randint(k4, (N_lb,), 0, C)
    labels_ulb = jax.random.randint(k4, (N_ulb,), 0, C)
    lb_one_hot = jax.nn.one_hot(labels_lb, C, dtype=jnp.float32)
    logits_x_lb = jax.random.normal(k5, (N_lb, C), dtype=jnp.float32)
    logits_x_ulb_1 = jax.random.normal(k6, (N_ulb, C), dtype=jnp.float32)
    logits_x_ulb_2 = jax.random.normal(k7, (N_ulb, C), dtype=jnp.float32)

    outs = self_nonparametric_vis_forward(
        anchor_feat, positive_feat, lb_feat, lb_one_hot,
        logits_x_lb, logits_x_ulb_1, logits_x_ulb_2,
        labels_lb, labels_ulb, aggregator_tau=tau,
    )
    outs = jax.block_until_ready(outs)

    # sanity check against a pure-JAX f32 reference of the aggregated logits.
    # Tolerance loosened for bf16 MXU operands / exp / output + approx recip.
    ref = _reference(anchor_feat, positive_feat, lb_feat,
                     logits_x_lb, logits_x_ulb_1, logits_x_ulb_2, tau)
    got = jnp.concatenate([outs[4], outs[5], outs[6]], axis=0)
    assert jnp.allclose(got, ref, atol=5e-2, rtol=5e-2), "mismatch vs reference"

    # output shape checks
    assert outs[4].shape == (N_lb, C)
    assert outs[5].shape == (N_ulb, C)
    assert outs[6].shape == (N_ulb, C)

    print("KERNEL_OK")
</pallas_src>

<mosaic_0001>
module attributes {stable_mosaic.version = 11 : i64} {
  func.func @_agg_kernel(%arg0: i32, %arg1: i32, %arg2: memref<8x128xbf16, #tpu.memory_space<vmem>>, %arg3: memref<128x128xbf16, #tpu.memory_space<vmem>>, %arg4: memref<128x128xbf16, #tpu.memory_space<vmem>>, %arg5: memref<1x128xf32, #tpu.memory_space<vmem>>, %arg6: memref<8x128xbf16, #tpu.memory_space<vmem>>, %arg7: memref<8x1xf32, #tpu.memory_space<vmem>>, %arg8: memref<8x128xf32, #tpu.memory_space<vmem>>) attributes {dimension_semantics = [#tpu.dimension_semantics<parallel>, #tpu.dimension_semantics<arbitrary>], iteration_bounds = array<i64: 16, 1>, scalar_prefetch = 0 : i64, scratch_operands = 2 : i64, tpu.core_type = #tpu.core_type<tc>, window_params = [{transform_indices = @transform_0, window_bounds = array<i64: 8, 128>}, {transform_indices = @transform_1, window_bounds = array<i64: 128, 128>}, {transform_indices = @transform_2, window_bounds = array<i64: 128, 128>}, {transform_indices = @transform_3, window_bounds = array<i64: 1, 128>}, {transform_indices = @transform_4, window_bounds = array<i64: 8, 128>}]} {
    %c0_i32 = arith.constant 0 : i32
    %0 = arith.cmpi eq, %arg1, %c0_i32 : i32
    %1 = arith.extui %0 : i1 to i32
    %c0_i32_0 = arith.constant 0 : i32
    %2 = arith.cmpi ne, %1, %c0_i32_0 : i32
    scf.if %2 {
      %cst_20 = arith.constant 0.000000e+00 : f32
      %24 = vector.broadcast %cst_20 : f32 to vector<8x1xf32>
      %c0_21 = arith.constant 0 : index
      %c0_22 = arith.constant 0 : index
      %25 = vector.load %arg7[%c0_21, %c0_22] : memref<8x1xf32, #tpu.memory_space<vmem>>, vector<8x1xf32>
      tpu.vector_store %arg7[%c0_21, %c0_22], %24 {strides = array<i32>} : memref<8x1xf32, #tpu.memory_space<vmem>>, vector<8x1xf32>,
      %cst_23 = arith.constant 0.000000e+00 : f32
      %26 = vector.broadcast %cst_23 : f32 to vector<8x128xf32>
      %c0_24 = arith.constant 0 : index
      %c0_25 = arith.constant 0 : index
      %27 = vector.load %arg8[%c0_24, %c0_25] : memref<8x128xf32, #tpu.memory_space<vmem>>, vector<8x128xf32>
      tpu.vector_store %arg8[%c0_24, %c0_25], %26 {strides = array<i32>} : memref<8x128xf32, #tpu.memory_space<vmem>>, vector<8x128xf32>,
    } else {
    }
    %c0 = arith.constant 0 : index
    %c0_1 = arith.constant 0 : index
    %3 = vector.load %arg2[%c0, %c0_1] : memref<8x128xbf16, #tpu.memory_space<vmem>>, vector<8x128xbf16>
    %c0_2 = arith.constant 0 : index
    %c0_3 = arith.constant 0 : index
    %4 = vector.load %arg3[%c0_2, %c0_3] : memref<128x128xbf16, #tpu.memory_space<vmem>>, vector<128x128xbf16>
    %cst = arith.constant dense<0.000000e+00> : vector<8x128xf32>
    %5 = tpu.matmul %3, %4, %cst {dimension_numbers = #tpu.dot_dimension_numbers<[1], [1], [0], [0], [0, 0, 1, 0], [], []>} : vector<8x128xbf16>, vector<128x128xbf16>, vector<8x128xf32> -> vector<8x128xf32>
    %c0_4 = arith.constant 0 : index
    %c0_5 = arith.constant 0 : index
    %6 = vector.load %arg5[%c0_4, %c0_5] : memref<1x128xf32, #tpu.memory_space<vmem>>, vector<1x128xf32>
    %7 = vector.broadcast %6 : vector<1x128xf32> to vector<8x128xf32>
    %8 = arith.addf %5, %7 : vector<8x128xf32>
    %9 = math.exp %8 : vector<8x128xf32>
    %c0_6 = arith.constant 0 : index
    %c0_7 = arith.constant 0 : index
    %10 = vector.load %arg7[%c0_6, %c0_7] : memref<8x1xf32, #tpu.memory_space<vmem>>, vector<8x1xf32>
    %cst_8 = arith.constant dense<0.000000e+00> : vector<8xf32>
    %11 = vector.multi_reduction <add>, %9, %cst_8 [1] : vector<8x128xf32> to vector<8xf32>
    %12 = vector.shape_cast %11 : vector<8xf32> to vector<8x1xf32>
    %13 = arith.addf %10, %12 : vector<8x1xf32>
    %c0_9 = arith.constant 0 : index
    %c0_10 = arith.constant 0 : index
    %14 = vector.load %arg7[%c0_9, %c0_10] : memref<8x1xf32, #tpu.memory_space<vmem>>, vector<8x1xf32>
    tpu.vector_store %arg7[%c0_9, %c0_10], %13 {strides = array<i32>} : memref<8x1xf32, #tpu.memory_space<vmem>>, vector<8x1xf32>,
    %15 = arith.truncf %9 : vector<8x128xf32> to vector<8x128xbf16>
    %c0_11 = arith.constant 0 : index
    %c0_12 = arith.constant 0 : index
    %16 = vector.load %arg8[%c0_11, %c0_12] : memref<8x128xf32, #tpu.memory_space<vmem>>, vector<8x128xf32>
    %c0_13 = arith.constant 0 : index
    %c0_14 = arith.constant 0 : index
    %17 = vector.load %arg4[%c0_13, %c0_14] : memref<128x128xbf16, #tpu.memory_space<vmem>>, vector<128x128xbf16>
    %cst_15 = arith.constant dense<0.000000e+00> : vector<8x128xf32>
    %18 = tpu.matmul %15, %17, %cst_15 {dimension_numbers = #tpu.dot_dimension_numbers<[1], [0], [0], [1], [0, 0, 1, 1], [], []>} : vector<8x128xbf16>, vector<128x128xbf16>, vector<8x128xf32> -> vector<8x128xf32>
    %19 = arith.addf %16, %18 : vector<8x128xf32>
    %c0_16 = arith.constant 0 : index
    %c0_17 = arith.constant 0 : index
    %20 = vector.load %arg8[%c0_16, %c0_17] : memref<8x128xf32, #tpu.memory_space<vmem>>, vector<8x128xf32>
    tpu.vector_store %arg8[%c0_16, %c0_17], %19 {strides = array<i32>} : memref<8x128xf32, #tpu.memory_space<vmem>>, vector<8x128xf32>,
    %c0_i32_18 = arith.constant 0 : i32
    %21 = arith.cmpi eq, %arg1, %c0_i32_18 : i32
    %22 = arith.extui %21 : i1 to i32
    %c0_i32_19 = arith.constant 0 : i32
    %23 = arith.cmpi ne, %22, %c0_i32_19 : i32
    scf.if %23 {
      %c0_20 = arith.constant 0 : index
      %c0_21 = arith.constant 0 : index
      %24 = vector.load %arg8[%c0_20, %c0_21] : memref<8x128xf32, #tpu.memory_space<vmem>>, vector<8x128xf32>
      %c0_22 = arith.constant 0 : index
      %c0_23 = arith.constant 0 : index
      %25 = vector.load %arg7[%c0_22, %c0_23] : memref<8x1xf32, #tpu.memory_space<vmem>>, vector<8x1xf32>
      %26 = tpu.reciprocal %25 {approx = true} : vector<8x1xf32> -> vector<8x1xf32>
      %27 = vector.broadcast %26 : vector<8x1xf32> to vector<8x128xf32>
      %28 = arith.mulf %24, %27 : vector<8x128xf32>
      %29 = arith.truncf %28 : vector<8x128xf32> to vector<8x128xbf16>
      %c0_24 = arith.constant 0 : index
      %c0_25 = arith.constant 0 : index
      %30 = vector.load %arg6[%c0_24, %c0_25] : memref<8x128xbf16, #tpu.memory_space<vmem>>, vector<8x128xbf16>
      tpu.vector_store %arg6[%c0_24, %c0_25], %29 {strides = array<i32>} : memref<8x128xbf16, #tpu.memory_space<vmem>>, vector<8x128xbf16>,
    } else {
    }
    return
  }
  func.func @transform_0(%arg0: i32, %arg1: i32) -> (i32, i32) {
    %c0_i32 = arith.constant 0 : i32
    %c0_i32_0 = arith.constant 0 : i32
    return %arg0, %c0_i32 : i32, i32
  }
  func.func @transform_1(%arg0: i32, %arg1: i32) -> (i32, i32) {
    %c0_i32 = arith.constant 0 : i32
    %c0_i32_0 = arith.constant 0 : i32
    return %arg1, %c0_i32 : i32, i32
  }
  func.func @transform_2(%arg0: i32, %arg1: i32) -> (i32, i32) {
    %c0_i32 = arith.constant 0 : i32
    %c0_i32_0 = arith.constant 0 : i32
    return %arg1, %c0_i32 : i32, i32
  }
  func.func @transform_3(%arg0: i32, %arg1: i32) -> (i32, i32) {
    %c0_i32 = arith.constant 0 : i32
    %c0_i32_0 = arith.constant 0 : i32
    return %c0_i32, %arg1 : i32, i32
  }
  func.func @transform_4(%arg0: i32, %arg1: i32) -> (i32, i32) {
    %c0_i32 = arith.constant 0 : i32
    %c0_i32_0 = arith.constant 0 : i32
    return %arg0, %c0_i32 : i32, i32
  }
}

</mosaic_0001>

<bundles_post_ra>
// kernel: tpu_custom_call.1
= control target key start
LH: loop header
LB: loop body
LE: loop exit
PB: predicated region body
PF: predicated region fallthrough
CT: control target
= control target key end

     0   :  { %9 = vsyncpa [#allocation5], 0  ;;  %s1326_s0 = inlined_call_operand.hbm [shape: bf16[128,128], index: 0, kind: input, shape index: {}]   ;;  %s1327_s1 = inlined_call_operand.hbm [shape: bf16[128,128], index: 1, kind: input, shape index: {}]   ;;  %s1328_s2 = inlined_call_operand.hbm [shape: bf16[128,128], index: 2, kind: input, shape index: {}]   ;;  %s1329_s3 = inlined_call_operand.vmem [shape: f32[1,128], index: 3, kind: input, shape index: {}]   ;;  %s1330_s4 = inlined_call_operand.hbm [shape: bf16[128,128], index: 4, kind: output, shape index: {}]  }
   0x1   :  { %11 = vsyncpa [#allocation5 + $0x1], 0 }
   0x2   :  { %12 = vsyncpa [#allocation8], 0 }
   0x3   :  { %13 = vsyncpa [#allocation6], 0 }
   0x4   :  { %15 = vsyncpa [#allocation6 + $0x1], 0  ;;  %s1073_s15 = smov 0   ;;  %s1075_s16 = smov 0  }
   0x5   :  { %s1077_s17 = smov 0   ;;  %s1079_s18 = smov 0  }
   0x6   :  { %s1081_s19 = smov 0   ;;  %s1083_s20 = smov 0  }
   0x7 LB: > { %s663_s21 = sadd.s32 4294967295, %s1037_s20   ;;  %s664_s22 = sadd.s32 4294967294, %s1037_s20   ;;  %s1037_s20 = sphi %s1083_s20, %s21_s20   ;;  %s1033_s19 = sphi %s1081_s19, %s1352_s19   ;;  %s1029_s18 = sphi %s1079_s18, %s1351_s18   ;;  %s1025_s17 = sphi %s1077_s17, %s1350_s17   ;;  %s1021_s16 = sphi %s1075_s16, %s1349_s16   ;;  %s1017_s15 = sphi %s1073_s15, %s1348_s15  }
   0x8   : > { %p53_p0 = scmp.ne.s32.totalorder %s1021_s16, %s1017_s15  ;;  %p1107_p1 = scmp.eq.s32.totalorder %s663_s21, 0 }
   0x9   : > { %p1111_p2 = scmp.eq.s32.totalorder %s663_s21, 15  ;;  %p161_p3 = scmp.eq.s32.totalorder %s664_s22, 15 }
   0xa   : > { %s1335_s23 = scalar_select %p1107_p1, 1, 0 }
   0xb   : > { %s1336_s24 = scalar_select %p1111_p2, 1, 0 }
   0xc   : > { %p1117_p4 = por %p1107_p1, %p53_p0  ;;  %p665_p5 = scmp.ge.s32.totalorder %s1037_s20, 1 }
   0xd   : > { %p1122_p6 = por %p161_p3, %p53_p0  ;;  %p168_p7 = scmp.lt.s32.totalorder %s1037_s20, 17 }
   0xe   : > { %s1337_s25 = scalar_select %p1117_p4, 1, 0 }
   0xf   : > { %s1338_s26 = scalar_select %p1122_p6, 1, 0 }
  0x10   : > { %p1127_p8 = pnand %p665_p5, %p168_p7  ;;  %s1039_s28 = smov [#allocation7]  }
  0x11   : > { %s183_s29 = sshll.u32 %s1039_s28, 4  ;;  %s1040_s5 = smov [#allocation9]   ;;  %s184_s29 = int_to_ptr.vmem [resolvable:$true] %s183_s29 }
  0x12   : > { %s1339_s27 = scalar_select %p1127_p8, 1, 0 }
  0x13   : > { %p768_p9 = pneg %p1127_p8  ;;  %s199_s6 = sshll.u32 %s1040_s5, 4  ;;  %s1139_s6 = int_to_ptr.vmem [resolvable:$true] %s199_s6 }
  0x14   : > { %s865_s9 = scalar_lea.hbm %s1327_s1, 1024 }
  0x15   : > { %p1135_p10 = pnand %p768_p9, %p1107_p1  ;;  %p866_p11 = scmp.ne.s32.totalorder %s1327_s1, %s865_s9 }
  0x16   : > { %p872_p3 = scmp.lt.u32.totalorder %s865_s9, %s1327_s1 }
  0x17   : > { %p867_p12 = pneg %p1135_p10 }
  0x19   : > { %p868_p13 = pnand %p867_p12, %p866_p11 }
  0x1b   : > { %p869_p0 = pneg %p868_p13 }
  0x1d   : > { %p874_p5 = pnand %p872_p3, %p869_p0 }
  0x1f   : > { %877 = shalt.err (!%p874_p5)
}
  0x20   : > { %s878_s14 = scalar_lea.vmem %s184_s29, 1024  ;;  %p886_p1 = scmp.lt.s32.totalorder %s184_s29, %s184_s29 }
  0x21   : > { %p879_p7 = scmp.ne.s32.totalorder %s184_s29, %s878_s14  ;;  %p887_p4 = scmp.lt.s32.totalorder %s878_s14, %s878_s14 }
  0x23   : > { %p881_p9 = pnand %p879_p7, %p867_p12  ;;  %p888_p8 = por %p887_p4, %p886_p1 }
  0x25   : > { %p882_p6 = pneg %p881_p9 }
  0x27   : > { %p889_p2 = pnand %p888_p8, %p882_p6 }
  0x29   : > { %892 = shalt.err (!%p889_p2)
}
  0x2a   : > { %s1041_s21 = smov 64   ;;  %s1042_s22 = smov 4  }
  0x2b   : > { %771 = dma.hbm_to_vmem [thread:$0]  (!%p1135_p10), %s1327_s1, 1024, %s184_s29, [#allocation8], %s1041_s21, %s1041_s21, %s1042_s22  }
  0x2c   : > { %s893_s9 = scalar_lea.hbm %s1328_s2, 1024 }
  0x2d   : > { %p894_p11 = scmp.ne.s32.totalorder %s1328_s2, %s893_s9  ;;  %p900_p4 = scmp.lt.u32.totalorder %s893_s9, %s1328_s2 }
  0x2f   : > { %p896_p1 = pnand %p894_p11, %p867_p12 }
  0x31   : > { %p897_p2 = pneg %p896_p1 }
  0x33   : > { %p902_p6 = pnand %p900_p4, %p897_p2 }
  0x35   : > { %905 = shalt.err (!%p902_p6)
}
  0x36   : > { %s906_s29 = scalar_lea.vmem %s1139_s6, 1024  ;;  %p914_p3 = scmp.lt.s32.totalorder %s1139_s6, %s1139_s6 }
  0x37   : > { %p907_p8 = scmp.ne.s32.totalorder %s1139_s6, %s906_s29  ;;  %p915_p5 = scmp.lt.s32.totalorder %s906_s29, %s906_s29 }
  0x39   : > { %p909_p13 = pnand %p907_p8, %p867_p12  ;;  %p916_p7 = por %p915_p5, %p914_p3 }
  0x3b   : > { %p910_p0 = pneg %p909_p13 }
  0x3d   : > { %p917_p9 = pnand %p916_p7, %p910_p0 }
  0x3f   : > { %920 = shalt.err (!%p917_p9)
}
  0x40   : > { %774 = dma.hbm_to_vmem [thread:$0]  (!%p1135_p10), %s1328_s2, 1024, %s1139_s6, [#allocation8], %s1041_s21, %s1041_s21, %s1042_s22  }
  0x41   : > { %s33_s5 = sadd.s32 1, %s1033_s19  ;;  %s40_s7 = sadd.s32 1, %s1025_s17 }
  0x42   : > { %p35_p12 = scmp.ge.s32.totalorder %s33_s5, 16  ;;  %p47_p11 = scmp.ne.s32.totalorder %s1025_s17, %s1021_s16 }
  0x43   : > { %p48_p1 = scmp.eq.s32.totalorder %s1037_s20, 0  ;;  %p785_p2 = scmp.lt.s32.totalorder %s1037_s20, 16 }
  0x44   : > { %s1354_s5 = smov (%p35_p12, %s33_s5), 0  ;;  %p1341_p6 = scmp.ne.s32.totalorder %s1336_s24, 0 }
  0x45   : > { %p49_p4 = por %p48_p1, %p47_p11  ;;  %s37_s8 = ssub.s32 %s1033_s19, %s1354_s5 }
  0x46   : > { %p1198_p8 = por %p1341_p6, %p47_p11  ;;  %s219_s9 = sand.u32 1, %s1025_s17  }
  0x47   : > { %p38_p13 = scmp.eq.s32.totalorder %s37_s8, 0  ;;  %s670_s6 = sshll.u32 %s219_s9, 2 }
  0x48   : > { %s671_s21 = sshll.u32 %s1033_s19, 6  ;;  %s223_s24 = scalar_lea.vmem [#allocation4], %s670_s6 }
  0x49   : > { %s1207_s22 = scalar_select %p38_p13, %s1025_s17, %s40_s7  }
  0x4a   : > { %s1212_s12 = scalar_lea.hbm %s1326_s0, %s671_s21  ;;  %s230_s13 = sshll.u32 %s223_s24, 4  ;;  %s1220_s13 = int_to_ptr.vmem [resolvable:$true] %s230_s13 }
  0x4b   : > { %p1216_p10 = pnand %p785_p2, %p49_p4  ;;  %s220_s14 = scalar_lea.sflag [#allocation5], %s219_s9 }
  0x4c   : > { %s921_s28 = scalar_lea.hbm %s1212_s12, 64  ;;  %s926_s6 = scalar_lea.hbm %s1326_s0, 1024 }
  0x4d   : > { %p922_p0 = scmp.ne.s32.totalorder %s1212_s12, %s921_s28  ;;  %p923_p3 = pneg %p1216_p10 }
  0x4e   : > { %p927_p9 = scmp.lt.u32.totalorder %s1212_s12, %s1326_s0  ;;  %p928_p12 = scmp.lt.u32.totalorder %s926_s6, %s921_s28 }
  0x4f   : > { %p924_p5 = pnand %p923_p3, %p922_p0  ;;  %p930_p1 = scmp.lt.u32.totalorder %s921_s28, %s1212_s12 }
  0x50   : > { %p929_p11 = por %p928_p12, %p927_p9 }
  0x51   : > { %p925_p7 = pneg %p924_p5 }
  0x52   : > { %p931_p2 = por %p930_p1, %p929_p11 }
  0x54   : > { %p932_p4 = pnand %p931_p2, %p925_p7 }
  0x56   : > { %935 = shalt.err (!%p932_p4)
}
  0x57   : > { %s936_s9 = scalar_lea.vmem %s1220_s13, 64  ;;  %s1043_s11 = smov [#allocation4]  }
  0x58   : > { %p937_p6 = scmp.ne.s32.totalorder %s1220_s13, %s936_s9  ;;  %s941_s24 = sshll.u32 %s1043_s11, 4  ;;  %s942_s24 = int_to_ptr.vmem [resolvable:$false] %s941_s24 }
  0x59   : > { %s943_s7 = scalar_lea.vmem %s942_s24, 128  ;;  %p944_p5 = scmp.lt.s32.totalorder %s1220_s13, %s942_s24 }
  0x5a   : > { %p939_p13 = pnand %p937_p6, %p923_p3  ;;  %p945_p9 = scmp.lt.s32.totalorder %s943_s7, %s936_s9 }
  0x5c   : > { %p940_p0 = pneg %p939_p13  ;;  %p946_p12 = por %p945_p9, %p944_p5 }
  0x5e   : > { %p947_p11 = pnand %p946_p12, %p940_p0 }
  0x60   : > { %950 = shalt.err (!%p947_p11)
}
  0x61   : > { %778 = dma.hbm_to_vmem [thread:$0]  (!%p1216_p10), %s1212_s12, 64, %s1220_s13, %s220_s14  }
  0x62   : > { %p1344_p7 = scmp.ne.s32.totalorder %s1339_s27, 0 }
  0x63   : > { %s1250_s28 = sand.u32 (!%p1344_p7), 1, %s1021_s16   ;;  %p1345_p3 = scmp.ne.s32.totalorder (!%p1344_p7), %s1337_s25, 0 }
  0x64   : > { %239 = sbr.rel (%p1344_p7) target bundleno = 713 (0x2c9), region = 36  ;;  %s673_s8 = sshll.u32 (!%p1344_p7), %s1250_s28, 2 }
  0x65   : > { %s242_s6 = scalar_lea.sflag (!%p1344_p7), [#allocation5], %s1250_s28  ;;  %s1256_s21 = scalar_lea.vmem (!%p1344_p7), [#allocation4], %s673_s8 }
  0x6b   : > { %1004 = dma.done.wait (%p1345_p3), %s242_s6, 64  }
  0x6c   : > { %1006 = vsyncadd (%p1345_p3), %s242_s6, 4294967232  ;;  %p1346_p10 = scmp.ne.s32.totalorder %s1335_s23, 0 }
  0x6e   : > { %1008 = dma.done.wait (%p1346_p10), [#allocation8], 2048  }
  0x6f   : > { %1010 = vsyncadd (%p1346_p10), [#allocation8], 4294965248  ;;  %v1044_v0 = vmov 0.0   ;;  %vm1045_vm0 = vmmov 0   ;;  %v845_v1 = vld [vmem:[#allocation7] sm:$0xff]   ;;  %v846_v2 = vld [vmem:[#allocation7 + $0x8] sm:$0xff]  }
  0x70   : > { %716 = vmatprep.subr.bf16.mxu0 %v1044_v0  ;;  %732 = vmatprep.mubr.msk.bf16.mxu0 %vm1045_vm0, %v1044_v0  ;;  %v853_v3 = vld [vmem:[#allocation9] sm:$0xff]   ;;  %v854_v4 = vld [vmem:[#allocation9 + $0x8] sm:$0xff]   ;;  %v847_v5 = vld [vmem:[#allocation7 + $0x10] sm:$0xff]   ;;  %vm291_vm1 = vcmask 7168   ;;  %v1046_v27 = vmov 0   ;;  %s695_s27 = sshll.u32 %s1029_s18, 6 }
  0x71   : > { %736 = vmatprep.subr.bf16.mxu1 %v1044_v0  ;;  %752 = vmatprep.mubr.msk.bf16.mxu1 %vm1045_vm0, %v1044_v0  ;;  %v855_v6 = vld [vmem:[#allocation9 + $0x10] sm:$0xff]   ;;  %v856_v7 = vld [vmem:[#allocation9 + $0x18] sm:$0xff]   ;;  %v849_v9 = vld [vmem:[#allocation7 + $0x20] sm:$0xff]   ;;  %292 = vst.msk [vmem:[#allocation2] sm:$0xff] %vm291_vm1, %v1044_v0  ;;  %s280_s12 = scalar_lea.vmem [#allocation10], %s673_s8  ;;  %s1278_s10 = scalar_lea.hbm %s1330_s4, %s695_s27 }
  0x72   : > { %717 = vmatpush3.bf16.xpose.msra.mxu0 %v845_v1  ;;  %737 = vmatpush3.bf16.msra.mxu1 %v853_v3  ;;  %v848_v8 = vld [vmem:[#allocation7 + $0x18] sm:$0xff]   ;;  %v850_v10 = vld [vmem:[#allocation7 + $0x28] sm:$0xff]   ;;  %v851_v11 = vld [vmem:[#allocation7 + $0x30] sm:$0xff]   ;;  %s550_s13 = sshll.u32 %s280_s12, 4  ;;  %s537_s9 = scalar_lea.sflag [#allocation6], %s1250_s28  ;;  %s1280_s13 = int_to_ptr.vmem [resolvable:$true] %s550_s13 }
  0x73   : > { %718 = vmatprep.subr.bf16.mxu0 %v1044_v0  ;;  %738 = vmatprep.subr.bf16.mxu1 %v1044_v0  ;;  %v852_v12 = vld [vmem:[#allocation7 + $0x38] sm:$0xff]   ;;  %v857_v14 = vld [vmem:[#allocation9 + $0x20] sm:$0xff]   ;;  %v858_v15 = vld [vmem:[#allocation9 + $0x28] sm:$0xff]   ;;  %s951_s11 = scalar_lea.vmem %s1280_s13, 64  ;;  %s1047_s18 = smov [#allocation10]  }
  0x74   : > { %v294_v13 = vld [vmem:[%s1256_s21] sm:$0xf]  ;;  %v859_v16 = vld [vmem:[#allocation9 + $0x30] sm:$0xff]   ;;  %844 = vset.pattern.permute.xlu0 %v1046_v27  ;;  %p952_p1 = scmp.ne.s32.totalorder %s1280_s13, %s951_s11  ;;  %s955_s24 = sshll.u32 %s1047_s18, 4  ;;  %s956_s24 = int_to_ptr.vmem [resolvable:$false] %s955_s24 }
  0x75   : > { %v860_v17 = vld [vmem:[#allocation9 + $0x38] sm:$0xff]   ;;  %v677_v18 = vld [vmem:[%s1329_s3] ss:$0 sm:$0xff]  ;;  %s957_s7 = scalar_lea.vmem %s956_s24, 128  ;;  %p958_p6 = scmp.lt.s32.totalorder %s1280_s13, %s956_s24 }
  0x76   : > { %739 = vmatpush3.bf16.msra.mxu1 %v854_v4  ;;  %p953_p2 = pnand %p952_p1, %p1198_p8  ;;  %p959_p13 = scmp.lt.s32.totalorder %s957_s7, %s951_s11 }
  0x77   : > { %740 = vmatprep.subr.bf16.mxu1 %v1044_v0 }
  0x78   : > { %v408_v28 = vld [vmem:[#allocation2] sm:$0xff]  ;;  %p954_p4 = pneg %p953_p2  ;;  %p960_p0 = por %p959_p13, %p958_p6 }
  0x7a   : > { %719 = vmatpush3.bf16.xpose.msra.mxu0 %v846_v2  ;;  %741 = vmatpush3.bf16.msra.mxu1 %v855_v6  ;;  %p961_p5 = pnand %p960_p0, %p954_p4 }
  0x7b   : > { %720 = vmatprep.subr.bf16.mxu0 %v1044_v0  ;;  %742 = vmatprep.subr.bf16.mxu1 %v1044_v0 }
  0x7e   : > { %743 = vmatpush3.bf16.msra.mxu1 %v856_v7 }
  0x7f   : > { %744 = vmatprep.subr.bf16.mxu1 %v1044_v0 }
  0x82   : > { %721 = vmatpush3.bf16.xpose.msra.mxu0 %v847_v5  ;;  %745 = vmatpush3.bf16.msra.mxu1 %v857_v14 }
  0x83   : > { %722 = vmatprep.subr.bf16.mxu0 %v1044_v0  ;;  %746 = vmatprep.subr.bf16.mxu1 %v1044_v0 }
  0x86   : > { %747 = vmatpush3.bf16.msra.mxu1 %v858_v15 }
  0x87   : > { %748 = vmatprep.subr.bf16.mxu1 %v1044_v0 }
  0x8a   : > { %723 = vmatpush3.bf16.xpose.msra.mxu0 %v848_v8  ;;  %749 = vmatpush3.bf16.msra.mxu1 %v859_v16 }
  0x8b   : > { %724 = vmatprep.subr.bf16.mxu0 %v1044_v0  ;;  %750 = vmatprep.subr.bf16.mxu1 %v1044_v0 }
  0x8e   : > { %751 = vmatpush3.bf16.msra.mxu1 %v860_v17 }
  0x92   : > { %725 = vmatpush3.bf16.xpose.msra.mxu0 %v849_v9 }
  0x93   : > { %726 = vmatprep.subr.bf16.mxu0 %v1044_v0 }
  0x9a   : > { %727 = vmatpush3.bf16.xpose.msra.mxu0 %v850_v10 }
  0x9b   : > { %728 = vmatprep.subr.bf16.mxu0 %v1044_v0 }
  0xa2   : > { %729 = vmatpush3.bf16.xpose.msra.mxu0 %v851_v11 }
  0xa3   : > { %730 = vmatprep.subr.bf16.mxu0 %v1044_v0 }
  0xaa   : > { %731 = vmatpush3.bf16.xpose.msra.mxu0 %v852_v12 }
  0xb1   : > { %733 = vmatmul.mubr.bf16.vlgmr.msra.gmra.mrb[0].mxu0 %v294_v13 }
 0x184   : > { %v400_v19 = vpop.f32.mrb[0].mxu0 }
 0x185   : > { %v401_v20 = vadd.f32 %v677_v18, %v400_v19  ;;  %v734_v21 = vpop.f32.mrb[1].mxu0 }
 0x186   : > { %v403_v22 = vpop.f32.mrb[2].mxu0 }
 0x187   : > { %v406_v23 = vmul.f32 1.442695, %v401_v20  ;;  %v735_v24 = vpop.f32.mrb[3].mxu0 }
 0x189   : > { %861 = vpow2.f32 %v406_v23 }
 0x193   : > { %v862_v25 = vpop.eup %861 }
 0x194   : > { %409 = vadd.xlane.f32.xlu0 %v862_v25  ;;  %v414_v26 = vpack.c.bf16 %v862_v25, %v862_v25 }
 0x196   : > { %753 = vmatmul.mubr.bf16.vlgmr.msra.gmra.mrb[0].mxu1 %v414_v26 }
 0x221   : > { %v410_v29 = vpop.xlane.xlu0 %409 }
 0x222   : > { %v411_v30 = vadd.f32 %v410_v29, %v408_v28 }
 0x224   : > { %413 = vst.msk [vmem:[#allocation2] sm:$0xff] %vm291_vm1, %v411_v30 }
 0x22b   : > { %v526_v31 = vld [vmem:[#allocation2] sm:$0xff] }
 0x22c   : > { %863 = vrcp.f32 %v526_v31 }
 0x236   : > { %v864_v32 = vpop.eup %863 }
 0x237   : > { %530 = vperm.xlu0 %844, %v864_v32  }
 0x269   : > { %v514_v33 = vpop.f32.mrb[0].mxu1 }
 0x26a   : > { %v754_v34 = vpop.f32.mrb[1].mxu1 }
 0x26b   : > { %v517_v35 = vpop.f32.mrb[2].mxu1 }
 0x26c   : > { %v755_v36 = vpop.f32.mrb[3].mxu1 }
 0x2b6   : > { %v531_v37 = vpop.permute.xlu0 %530 }
 0x2b7   : > { %v533_v38 = vmul.f32 %v531_v37, %v514_v33 }
 0x2b9   : > { %v534_v39 = vpack.c.bf16 %v533_v38, %v533_v38 }
 0x2bb   : > { %535 = vst [vmem:[%s280_s12] sm:$0xf] %v534_v39 }
 0x2bc   : > { %964 = shalt.err (!%p961_p5)
}
 0x2bd   : > { %s965_s28 = scalar_lea.hbm %s1278_s10, 64  ;;  %s969_s21 = scalar_lea.hbm %s1330_s4, 1024 }
 0x2be   : > { %p966_p9 = scmp.ne.s32.totalorder %s1278_s10, %s965_s28  ;;  %p970_p7 = scmp.lt.u32.totalorder %s1278_s10, %s1330_s4 }
 0x2bf   : > { %p971_p3 = scmp.lt.u32.totalorder %s969_s21, %s965_s28  ;;  %p973_p1 = scmp.lt.u32.totalorder %s965_s28, %s1278_s10 }
 0x2c0   : > { %p967_p12 = pnand %p966_p9, %p1198_p8 }
 0x2c1   : > { %p972_p10 = por %p971_p3, %p970_p7 }
 0x2c2   : > { %p968_p11 = pneg %p967_p12 }
 0x2c3   : > { %p974_p2 = por %p973_p1, %p972_p10 }
 0x2c5   : > { %p975_p4 = pnand %p974_p2, %p968_p11 }
 0x2c7   : > { %978 = shalt.err (!%p975_p4)
}
 0x2c8   : > { %766 = dma.vmem_to_hbm [thread:$0]  (%p1198_p8), %s1280_s13, 64, %s1278_s10, %s537_s9  }
 0x2c9 PF: > { %p788_p6 = scmp.ge.s32.totalorder %s1037_s20, 2  ;;  %s562_s27 = sand.u32 1, %s1017_s15  }
 0x2ca   : > { %p1347_p13 = scmp.ne.s32.totalorder %s1338_s26, 0  ;;  %s563_s12 = scalar_lea.sflag [#allocation6], %s562_s27 }
 0x2cc   : > { %p780_p0 = pnand %p788_p6, %p1347_p13 }
 0x2ce   : > { %1012 = dma.done.wait (!%p780_p0), %s563_s12, 64  }
 0x2cf   : > { %1014 = vsyncadd (!%p780_p0), %s563_s12, 4294967232  ;;  %s21_s20 = sadd.s32 1, %s1037_s20   ;;  %s1348_s15 = smov %s1021_s16 }
 0x2d0   : > { %p18_p5 = scmp.ge.s32.totalorder %s21_s20, 18   ;;  %s1349_s16 = smov %s1025_s17 }
 0x2d1   : > { %s1350_s17 = smov %s1207_s22  ;;  %s1351_s18 = smov %s1033_s19 }
 0x2d2   : > { %s1352_s19 = smov %s1354_s5  ;;  %20 = sbr.rel (!%p18_p5) target bundleno = 7 (0x7), region = 102 }
 0x2d9   :  { %568 = vsyncpa [#allocation5], 1 }
 0x2da   :  { %570 = vsyncpa [#allocation5 + $0x1], 1 }
 0x2db   :  { %571 = vsyncpa [#allocation8], 1 }
 0x2dc   :  { %572 = vsyncpa [#allocation6], 1 }
 0x2dd   :  { %574 = vsyncpa [#allocation6 + $0x1], 1 }

</bundles_post_ra>
